<compile_context>
chip_gen: v7x
topology: tpu7x:2x2x1
jax: 0.10.0
libtpu: 0.0.40
codegen_flags: <defaults>
</compile_context>

<pallas_src>
import functools

import jax
import jax.numpy as jnp
from jax.experimental import pallas as pl
from jax.experimental.pallas import tpu as pltpu


def _default_tile_and_vmem():
    """Per-chip token-tile and scoped-VMEM defaults."""
    vmem_cap = 64 * 1024 * 1024
    try:
        vmem_cap = int(pltpu.get_tpu_info().vmem_capacity_bytes)
    except Exception:
        pass
    if vmem_cap >= 96 * 1024 * 1024:          # v5e / v6e: 128 MiB VMEM
        return 1024, 64 * 1024 * 1024
    return 512, 40 * 1024 * 1024              # v7x: 64 MiB per TensorCore


# ---------------------------------------------------------------------------
# Pallas kernel: MLP(spatial_sum) + tok_sum -> LayerNorm
# ---------------------------------------------------------------------------
def _layoutlm_emb_kernel(
    spatial_ref,            # (TILE_N, H) bf16 : left+upper+right+lower+h+w
    tok_ref,                # (TILE_N, H) f32  : words + position + token_type
    w1_ref, b1_ref,         # (H, H) bf16 (in, out layout), (1, H) f32
    w2_ref, b2_ref,         # (H, H) bf16 (in, out layout), (1, H) f32
    gamma_ref, beta_ref,    # (1, H) f32 LayerNorm params
    out_ref,                # (TILE_N, H) out dtype
    *, eps: float, inv_h: float,
):
    # doc_linear1 -> ReLU.  Canonical MXU matmul (x @ W), f32 accumulation.
    hdn = jnp.dot(spatial_ref[...], w1_ref[...],
                  preferred_element_type=jnp.float32)
    hdn = jnp.maximum(hdn + b1_ref[...], 0.0)

    # doc_linear2
    temp = jnp.dot(hdn.astype(jnp.bfloat16), w2_ref[...],
                   preferred_element_type=jnp.float32)

    # Combine with word/position/token_type embeddings (f32 bypass stream).
    emb = tok_ref[...] + (temp + b2_ref[...])

    # LayerNorm over hidden axis: single-pass moments + fused scale/shift.
    s = jnp.sum(emb, axis=-1, keepdims=True)
    ss = jnp.sum(emb * emb, axis=-1, keepdims=True)
    mean = s * inv_h
    var = jnp.maximum(ss * inv_h - mean * mean, 0.0)
    scale = jax.lax.rsqrt(var + eps) * gamma_ref[...]       # (n,1)*(1,H)
    out_ref[...] = ((emb - mean) * scale + beta_ref[...]).astype(out_ref.dtype)


# ---------------------------------------------------------------------------
# Wrapper: gathers + pre-reduction in JAX, hot path in Pallas
# ---------------------------------------------------------------------------
def layoutlm_embeddings_pallas(
    input_ids, bbox, params, *, layer_norm_eps=1e-12, token_type_ids=None,
    position_ids=None, tile_n=None, vmem_limit_bytes=None,
    out_dtype=jnp.bfloat16,
):
    """JAX/Pallas implementation of Layoutlmv1Embeddings.forward (eval mode)."""
    B, L = input_ids.shape
    H = params["word_emb"].shape[1]
    N = B * L

    base_tile, base_vmem = _default_tile_and_vmem()
    if tile_n is None:
        tile_n = base_tile
    if vmem_limit_bytes is None:
        vmem_limit_bytes = base_vmem

    if position_ids is None:
        position_ids = jnp.broadcast_to(
            jnp.arange(L, dtype=jnp.int32)[None, :], (B, L))
    if token_type_ids is None:
        token_type_ids = jnp.zeros_like(input_ids)

    # ------- embedding gathers + pre-reduction (glue, fuses in XLA) -------
    take = lambda tbl, ids: jnp.take(tbl, ids.reshape(-1), axis=0)  # (N, H)
    tok_sum = (take(params["word_emb"], input_ids)
               + take(params["pos_emb"], position_ids)
               + take(params["tok_type_emb"], token_type_ids))
    spatial_sum = (take(params["x_emb"], bbox[:, :, 0])
                   + take(params["y_emb"], bbox[:, :, 1])
                   + take(params["x_emb"], bbox[:, :, 2])
                   + take(params["y_emb"], bbox[:, :, 3])
                   + take(params["h_emb"], bbox[:, :, 3] - bbox[:, :, 1])
                   + take(params["w_emb"], bbox[:, :, 2] - bbox[:, :, 0]))

    # bf16 only where it feeds the MXU; the LayerNorm bypass stream, biases
    # and LN params stay f32 for accuracy.
    spatial_sum = spatial_sum.astype(jnp.bfloat16)
    tok_sum = tok_sum.astype(jnp.float32)
    # One-time transpose to (in, out) so the kernel does a canonical x @ W.
    w1 = jnp.transpose(params["doc_w1"]).astype(jnp.bfloat16)
    w2 = jnp.transpose(params["doc_w2"]).astype(jnp.bfloat16)
    b1 = params["doc_b1"][None, :].astype(jnp.float32)
    b2 = params["doc_b2"][None, :].astype(jnp.float32)
    gamma = params["ln_gamma"][None, :].astype(jnp.float32)
    beta = params["ln_beta"][None, :].astype(jnp.float32)

    # ------- tile over the token axis (no pad / slice round trip) -------
    if N <= tile_n:
        tile_n = N                      # single full-extent block: always legal
    grid = (pl.cdiv(N, tile_n),)        # ragged last block clipped by Pallas

    stream_spec = lambda: pl.BlockSpec((tile_n, H), lambda i: (i, 0))
    resident = lambda shape: pl.BlockSpec(shape, lambda i: (0, 0))

    out_itemsize = jnp.dtype(out_dtype).itemsize
    cost = pl.CostEstimate(
        flops=4 * N * H * H,                       # two (n,H)@(H,H) matmuls
        transcendentals=N,                         # rsqrt per row
        bytes_accessed=(N * H * 2                  # spatial stream (bf16)
                        + N * H * 4                # tok_sum stream (f32)
                        + 2 * H * H * 2            # weights (bf16)
                        + 4 * H * 4                # biases + LN params (f32)
                        + N * H * out_itemsize),   # output
    )

    out = pl.pallas_call(
        functools.partial(_layoutlm_emb_kernel, eps=float(layer_norm_eps),
                          inv_h=1.0 / H),
        out_shape=jax.ShapeDtypeStruct((N, H), out_dtype),
        grid=grid,
        in_specs=[stream_spec(), stream_spec(),
                  resident((H, H)), resident((1, H)),
                  resident((H, H)), resident((1, H)),
                  resident((1, H)), resident((1, H))],
        out_specs=pl.BlockSpec((tile_n, H), lambda i: (i, 0)),
        compiler_params=pltpu.CompilerParams(
            dimension_semantics=("parallel",),      # megacore sharding on v7x
            vmem_limit_bytes=vmem_limit_bytes),
        cost_estimate=cost,
    )(spatial_sum, tok_sum, w1, b1, w2, b2, gamma, beta)

    return out.reshape(B, L, H)


# ---------------------------------------------------------------------------
# Pure-JAX reference (f32) for correctness checking
# ---------------------------------------------------------------------------
def layoutlm_embeddings_ref(input_ids, bbox, params, *, layer_norm_eps=1e-12):
    B, L = input_ids.shape
    position_ids = jnp.broadcast_to(jnp.arange(L, dtype=jnp.int32)[None, :],
                                    (B, L))
    token_type_ids = jnp.zeros_like(input_ids)
    take = lambda tbl, ids: tbl[ids]
    words = take(params["word_emb"], input_ids)
    pos = take(params["pos_emb"], position_ids)
    tt = take(params["tok_type_emb"], token_type_ids)
    spatial = (take(params["x_emb"], bbox[..., 0])
               + take(params["y_emb"], bbox[..., 1])
               + take(params["x_emb"], bbox[..., 2])
               + take(params["y_emb"], bbox[..., 3])
               + take(params["h_emb"], bbox[..., 3] - bbox[..., 1])
               + take(params["w_emb"], bbox[..., 2] - bbox[..., 0]))
    hdn = jnp.maximum(spatial @ params["doc_w1"].T + params["doc_b1"], 0.0)
    temp = hdn @ params["doc_w2"].T + params["doc_b2"]
    emb = words + pos + temp + tt
    mean = emb.mean(-1, keepdims=True)
    centered = emb - mean
    var = (centered * centered).mean(-1, keepdims=True)
    normed = centered * jax.lax.rsqrt(var + layer_norm_eps)
    return normed * params["ln_gamma"] + params["ln_beta"]


# ---------------------------------------------------------------------------
# Deterministic parameter construction (synthetic; no checkpoint load)
# ---------------------------------------------------------------------------
def make_params(key, *, vocab_size, max_position_embeddings,
                max_2d_position_embeddings, type_vocab_size, hidden_size):
    keys = jax.random.split(key, 12)
    init = lambda k, shape: (0.02 * jax.random.normal(k, shape)).astype(jnp.float32)

    word_emb = init(keys[0], (vocab_size, hidden_size))
    word_emb = word_emb.at[0].set(0.0)  # padding_idx=0 row zeroed (PyTorch semantics)

    return {
        "word_emb": word_emb,
        "pos_emb": init(keys[1], (max_position_embeddings, hidden_size)),
        "x_emb": init(keys[2], (max_2d_position_embeddings, hidden_size)),
        "y_emb": init(keys[3], (max_2d_position_embeddings, hidden_size)),
        "h_emb": init(keys[4], (max_2d_position_embeddings, hidden_size)),
        "w_emb": init(keys[5], (max_2d_position_embeddings, hidden_size)),
        "tok_type_emb": init(keys[6], (type_vocab_size, hidden_size)),
        "doc_w1": init(keys[7], (hidden_size, hidden_size)),   # PyTorch (out, in)
        "doc_b1": init(keys[8], (hidden_size,)),
        "doc_w2": init(keys[9], (hidden_size, hidden_size)),
        "doc_b2": init(keys[10], (hidden_size,)),
        "ln_gamma": jnp.ones((hidden_size,), jnp.float32),
        "ln_beta": jnp.zeros((hidden_size,), jnp.float32),
    }


if __name__ == "__main__":
    # Small config consistent with the module.
    VOCAB = 100
    MAX_POS = 64
    MAX_2D = 1024
    TYPE_VOCAB = 2
    HIDDEN = 32
    B, L = 2, 8
    EPS = 1e-12

    key = jax.random.PRNGKey(0)
    k_param, k_ids, k_x0, k_y0, k_w, k_h = jax.random.split(key, 6)

    params = make_params(
        k_param,
        vocab_size=VOCAB,
        max_position_embeddings=MAX_POS,
        max_2d_position_embeddings=MAX_2D,
        type_vocab_size=TYPE_VOCAB,
        hidden_size=HIDDEN,
    )

    input_ids = jax.random.randint(k_ids, (B, L), 0, VOCAB, dtype=jnp.int32)

    # bbox: (B, L, 4) = [x0, y0, x1, y1] with x1 >= x0, y1 >= y0, values < 1024
    x0 = jax.random.randint(k_x0, (B, L), 0, 512, dtype=jnp.int32)
    y0 = jax.random.randint(k_y0, (B, L), 0, 512, dtype=jnp.int32)
    ww = jax.random.randint(k_w, (B, L), 0, 512, dtype=jnp.int32)
    hh = jax.random.randint(k_h, (B, L), 0, 512, dtype=jnp.int32)
    bbox = jnp.stack([x0, y0, x0 + ww, y0 + hh], axis=-1)

    # Default path: bf16 output (production config).
    out_bf16 = layoutlm_embeddings_pallas(input_ids, bbox, params,
                                          layer_norm_eps=EPS)
    jax.block_until_ready(out_bf16)
    assert out_bf16.shape == (B, L, HIDDEN)
    assert out_bf16.dtype == jnp.bfloat16

    # f32-output path for a tight correctness bound.
    out_f32 = layoutlm_embeddings_pallas(input_ids, bbox, params,
                                         layer_norm_eps=EPS,
                                         out_dtype=jnp.float32)
    jax.block_until_ready(out_f32)

    ref = layoutlm_embeddings_ref(input_ids, bbox, params, layer_norm_eps=EPS)
    err_f32 = float(jnp.max(jnp.abs(out_f32 - ref)))
    err_bf16 = float(jnp.max(jnp.abs(out_bf16.astype(jnp.float32) - ref)))
    assert err_f32 < 1e-2, f"f32-output max abs error {err_f32} too large"
    assert err_bf16 < 5e-2, f"bf16-output max abs error {err_bf16} too large"

    print("KERNEL_OK")
</pallas_src>

<mosaic_0001>
module attributes {stable_mosaic.version = 11 : i64} {
  func.func @_layoutlm_emb_kernel(%arg0: i32, %arg1: memref<16x32xbf16, #tpu.memory_space<vmem>>, %arg2: memref<16x32xf32, #tpu.memory_space<vmem>>, %arg3: memref<32x32xbf16, #tpu.memory_space<vmem>>, %arg4: memref<1x32xf32, #tpu.memory_space<vmem>>, %arg5: memref<32x32xbf16, #tpu.memory_space<vmem>>, %arg6: memref<1x32xf32, #tpu.memory_space<vmem>>, %arg7: memref<1x32xf32, #tpu.memory_space<vmem>>, %arg8: memref<1x32xf32, #tpu.memory_space<vmem>>, %arg9: memref<16x32xbf16, #tpu.memory_space<vmem>>) attributes {dimension_semantics = [#tpu.dimension_semantics<parallel>], iteration_bounds = array<i64: 1>, scalar_prefetch = 0 : i64, scratch_operands = 0 : i64, tpu.core_type = #tpu.core_type<tc>, window_params = [{transform_indices = @transform_0, window_bounds = array<i64: 16, 32>}, {transform_indices = @transform_1, window_bounds = array<i64: 16, 32>}, {pipeline_mode = #tpu.pipeline_mode<synchronous>, transform_indices = @transform_2, window_bounds = array<i64: 32, 32>}, {pipeline_mode = #tpu.pipeline_mode<synchronous>, transform_indices = @transform_3, window_bounds = array<i64: 1, 32>}, {pipeline_mode = #tpu.pipeline_mode<synchronous>, transform_indices = @transform_4, window_bounds = array<i64: 32, 32>}, {pipeline_mode = #tpu.pipeline_mode<synchronous>, transform_indices = @transform_5, window_bounds = array<i64: 1, 32>}, {pipeline_mode = #tpu.pipeline_mode<synchronous>, transform_indices = @transform_6, window_bounds = array<i64: 1, 32>}, {pipeline_mode = #tpu.pipeline_mode<synchronous>, transform_indices = @transform_7, window_bounds = array<i64: 1, 32>}, {transform_indices = @transform_8, window_bounds = array<i64: 16, 32>}]} {
    %c0 = arith.constant 0 : index
    %c0_0 = arith.constant 0 : index
    %0 = vector.load %arg1[%c0, %c0_0] : memref<16x32xbf16, #tpu.memory_space<vmem>>, vector<16x32xbf16>
    %c0_1 = arith.constant 0 : index
    %c0_2 = arith.constant 0 : index
    %1 = vector.load %arg3[%c0_1, %c0_2] : memref<32x32xbf16, #tpu.memory_space<vmem>>, vector<32x32xbf16>
    %cst = arith.constant dense<0.000000e+00> : vector<16x32xf32>
    %2 = tpu.matmul %0, %1, %cst {dimension_numbers = #tpu.dot_dimension_numbers<[1], [0], [0], [1], [0, 0, 1, 1], [], []>} : vector<16x32xbf16>, vector<32x32xbf16>, vector<16x32xf32> -> vector<16x32xf32>
    %c0_3 = arith.constant 0 : index
    %c0_4 = arith.constant 0 : index
    %3 = vector.load %arg4[%c0_3, %c0_4] : memref<1x32xf32, #tpu.memory_space<vmem>>, vector<1x32xf32>
    %4 = vector.broadcast %3 : vector<1x32xf32> to vector<16x32xf32>
    %5 = arith.addf %2, %4 : vector<16x32xf32>
    %cst_5 = arith.constant 0.000000e+00 : f32
    %6 = vector.broadcast %cst_5 : f32 to vector<16x32xf32>
    %7 = arith.maximumf %5, %6 : vector<16x32xf32>
    %8 = arith.truncf %7 : vector<16x32xf32> to vector<16x32xbf16>
    %c0_6 = arith.constant 0 : index
    %c0_7 = arith.constant 0 : index
    %9 = vector.load %arg5[%c0_6, %c0_7] : memref<32x32xbf16, #tpu.memory_space<vmem>>, vector<32x32xbf16>
    %cst_8 = arith.constant dense<0.000000e+00> : vector<16x32xf32>
    %10 = tpu.matmul %8, %9, %cst_8 {dimension_numbers = #tpu.dot_dimension_numbers<[1], [0], [0], [1], [0, 0, 1, 1], [], []>} : vector<16x32xbf16>, vector<32x32xbf16>, vector<16x32xf32> -> vector<16x32xf32>
    %c0_9 = arith.constant 0 : index
    %c0_10 = arith.constant 0 : index
    %11 = vector.load %arg2[%c0_9, %c0_10] : memref<16x32xf32, #tpu.memory_space<vmem>>, vector<16x32xf32>
    %c0_11 = arith.constant 0 : index
    %c0_12 = arith.constant 0 : index
    %12 = vector.load %arg6[%c0_11, %c0_12] : memref<1x32xf32, #tpu.memory_space<vmem>>, vector<1x32xf32>
    %13 = vector.broadcast %12 : vector<1x32xf32> to vector<16x32xf32>
    %14 = arith.addf %10, %13 : vector<16x32xf32>
    %15 = arith.addf %11, %14 : vector<16x32xf32>
    %cst_13 = arith.constant dense<0.000000e+00> : vector<16xf32>
    %16 = vector.multi_reduction <add>, %15, %cst_13 [1] : vector<16x32xf32> to vector<16xf32>
    %17 = vector.shape_cast %16 : vector<16xf32> to vector<16x1xf32>
    %18 = arith.mulf %15, %15 : vector<16x32xf32>
    %cst_14 = arith.constant dense<0.000000e+00> : vector<16xf32>
    %19 = vector.multi_reduction <add>, %18, %cst_14 [1] : vector<16x32xf32> to vector<16xf32>
    %20 = vector.shape_cast %19 : vector<16xf32> to vector<16x1xf32>
    %cst_15 = arith.constant 3.125000e-02 : f32
    %21 = vector.broadcast %cst_15 : f32 to vector<16x1xf32>
    %22 = arith.mulf %17, %21 : vector<16x1xf32>
    %cst_16 = arith.constant 3.125000e-02 : f32
    %23 = vector.broadcast %cst_16 : f32 to vector<16x1xf32>
    %24 = arith.mulf %20, %23 : vector<16x1xf32>
    %25 = arith.mulf %22, %22 : vector<16x1xf32>
    %26 = arith.subf %24, %25 : vector<16x1xf32>
    %cst_17 = arith.constant 0.000000e+00 : f32
    %27 = vector.broadcast %cst_17 : f32 to vector<16x1xf32>
    %28 = arith.maximumf %26, %27 : vector<16x1xf32>
    %cst_18 = arith.constant 9.99999996E-13 : f32
    %29 = vector.broadcast %cst_18 : f32 to vector<16x1xf32>
    %30 = arith.addf %28, %29 : vector<16x1xf32>
    %31 = math.rsqrt %30 : vector<16x1xf32>
    %c0_19 = arith.constant 0 : index
    %c0_20 = arith.constant 0 : index
    %32 = vector.load %arg7[%c0_19, %c0_20] : memref<1x32xf32, #tpu.memory_space<vmem>>, vector<1x32xf32>
    %33 = vector.broadcast %31 : vector<16x1xf32> to vector<16x32xf32>
    %34 = vector.broadcast %32 : vector<1x32xf32> to vector<16x32xf32>
    %35 = arith.mulf %33, %34 : vector<16x32xf32>
    %36 = vector.broadcast %22 : vector<16x1xf32> to vector<16x32xf32>
    %37 = arith.subf %15, %36 : vector<16x32xf32>
    %38 = arith.mulf %37, %35 : vector<16x32xf32>
    %c0_21 = arith.constant 0 : index
    %c0_22 = arith.constant 0 : index
    %39 = vector.load %arg8[%c0_21, %c0_22] : memref<1x32xf32, #tpu.memory_space<vmem>>, vector<1x32xf32>
    %40 = vector.broadcast %39 : vector<1x32xf32> to vector<16x32xf32>
    %41 = arith.addf %38, %40 : vector<16x32xf32>
    %42 = arith.truncf %41 : vector<16x32xf32> to vector<16x32xbf16>
    %c0_23 = arith.constant 0 : index
    %c0_24 = arith.constant 0 : index
    %43 = vector.load %arg9[%c0_23, %c0_24] : memref<16x32xbf16, #tpu.memory_space<vmem>>, vector<16x32xbf16>
    tpu.vector_store %arg9[%c0_23, %c0_24], %42 {strides = array<i32>} : memref<16x32xbf16, #tpu.memory_space<vmem>>, vector<16x32xbf16>,
    return
  }
  func.func @transform_0(%arg0: i32) -> (i32, i32) {
    %c0_i32 = arith.constant 0 : i32
    %c0_i32_0 = arith.constant 0 : i32
    return %arg0, %c0_i32 : i32, i32
  }
  func.func @transform_1(%arg0: i32) -> (i32, i32) {
    %c0_i32 = arith.constant 0 : i32
    %c0_i32_0 = arith.constant 0 : i32
    return %arg0, %c0_i32 : i32, i32
  }
  func.func @transform_2(%arg0: i32) -> (i32, i32) {
    %c0_i32 = arith.constant 0 : i32
    %c0_i32_0 = arith.constant 0 : i32
    %c0_i32_1 = arith.constant 0 : i32
    return %c0_i32, %c0_i32_0 : i32, i32
  }
  func.func @transform_3(%arg0: i32) -> (i32, i32) {
    %c0_i32 = arith.constant 0 : i32
    %c0_i32_0 = arith.constant 0 : i32
    %c0_i32_1 = arith.constant 0 : i32
    return %c0_i32, %c0_i32_0 : i32, i32
  }
  func.func @transform_4(%arg0: i32) -> (i32, i32) {
    %c0_i32 = arith.constant 0 : i32
    %c0_i32_0 = arith.constant 0 : i32
    %c0_i32_1 = arith.constant 0 : i32
    return %c0_i32, %c0_i32_0 : i32, i32
  }
  func.func @transform_5(%arg0: i32) -> (i32, i32) {
    %c0_i32 = arith.constant 0 : i32
    %c0_i32_0 = arith.constant 0 : i32
    %c0_i32_1 = arith.constant 0 : i32
    return %c0_i32, %c0_i32_0 : i32, i32
  }
  func.func @transform_6(%arg0: i32) -> (i32, i32) {
    %c0_i32 = arith.constant 0 : i32
    %c0_i32_0 = arith.constant 0 : i32
    %c0_i32_1 = arith.constant 0 : i32
    return %c0_i32, %c0_i32_0 : i32, i32
  }
  func.func @transform_7(%arg0: i32) -> (i32, i32) {
    %c0_i32 = arith.constant 0 : i32
    %c0_i32_0 = arith.constant 0 : i32
    %c0_i32_1 = arith.constant 0 : i32
    return %c0_i32, %c0_i32_0 : i32, i32
  }
  func.func @transform_8(%arg0: i32) -> (i32, i32) {
    %c0_i32 = arith.constant 0 : i32
    %c0_i32_0 = arith.constant 0 : i32
    return %arg0, %c0_i32 : i32, i32
  }
}

</mosaic_0001>

<bundles_post_ra>
// kernel: tpu_custom_call.1
= control target key start
LH: loop header
LB: loop body
LE: loop exit
PB: predicated region body
PF: predicated region fallthrough
CT: control target
= control target key end

     0   :  { %13 = vsyncpa [#allocation3], 0  ;;  %s643_s0 = inlined_call_operand.hbm [shape: bf16[16,32], index: 0, kind: input, shape index: {}]   ;;  %s644_s1 = inlined_call_operand.hbm [shape: f32[16,32], index: 1, kind: input, shape index: {}]   ;;  %s645_s2 = inlined_call_operand.hbm [shape: bf16[32,32], index: 2, kind: input, shape index: {}]   ;;  %s646_s3 = inlined_call_operand.vmem [shape: f32[1,32], index: 3, kind: input, shape index: {}]   ;;  %s647_s4 = inlined_call_operand.hbm [shape: bf16[32,32], index: 4, kind: input, shape index: {}]   ;;  %s648_s5 = inlined_call_operand.vmem [shape: f32[1,32], index: 5, kind: input, shape index: {}]   ;;  %s649_s6 = inlined_call_operand.vmem [shape: f32[1,32], index: 6, kind: input, shape index: {}]   ;;  %s650_s7 = inlined_call_operand.vmem [shape: f32[1,32], index: 7, kind: input, shape index: {}]   ;;  %s651_s8 = inlined_call_operand.hbm [shape: bf16[16,32], index: 8, kind: output, shape index: {}]  }
   0x1   :  { %14 = vsyncpa [#allocation6], 0 }
   0x2   :  { %15 = vsyncpa [#allocation9], 0 }
   0x3   :  { %16 = vsyncpa [#allocation4], 0  ;;  %s490_s27 = smov [#allocation5]   ;;  %s372_s9 = scalar_lea.hbm %s644_s1, 256 }
   0x4   :  { %s34_s28 = sshll.u32 %s490_s27, 4  ;;  %p373_p0 = scmp.ne.s32.totalorder %s644_s1, %s372_s9  ;;  %s35_s28 = int_to_ptr.vmem [resolvable:$true] %s34_s28 }
   0x5   :  { %p376_p1 = scmp.lt.u32.totalorder %s372_s9, %s644_s1 }
   0x7   :  { %p378_p2 = pnand %p376_p1, %p373_p0 }
   0x9   :  { %381 = shalt.err (!%p378_p2)
}
   0xa   :  { %s382_s14 = scalar_lea.vmem %s35_s28, 256  ;;  %p387_p4 = scmp.lt.s32.totalorder %s35_s28, %s35_s28 }
   0xb   :  { %p383_p3 = scmp.ne.s32.totalorder %s35_s28, %s382_s14  ;;  %p388_p5 = scmp.lt.s32.totalorder %s382_s14, %s382_s14 }
   0xd   :  { %p389_p6 = por %p388_p5, %p387_p4 }
   0xf   :  { %p390_p7 = pnand %p389_p6, %p383_p3 }
  0x11   :  { %393 = shalt.err (!%p390_p7)
}
  0x12   :  { %s491_s15 = smov 128   ;;  %s492_s16 = smov 8  }
  0x13   :  { %40 = dma.hbm_to_vmem [thread:$0]  %s644_s1, 256, %s35_s28, [#allocation6], %s491_s15, %s491_s15, %s492_s16  }
  0x14   :  { %s493_s19 = smov [#allocation2]   ;;  %s394_s23 = scalar_lea.hbm %s643_s0, 128 }
  0x15   :  { %s22_s20 = sshll.u32 %s493_s19, 4  ;;  %p395_p8 = scmp.ne.s32.totalorder %s643_s0, %s394_s23  ;;  %s23_s20 = int_to_ptr.vmem [resolvable:$true] %s22_s20 }
  0x16   :  { %p398_p9 = scmp.lt.u32.totalorder %s394_s23, %s643_s0 }
  0x18   :  { %p400_p10 = pnand %p398_p9, %p395_p8 }
  0x1a   :  { %403 = shalt.err (!%p400_p10)
}
  0x1b   :  { %s404_s29 = scalar_lea.vmem %s23_s20, 128  ;;  %p409_p12 = scmp.lt.s32.totalorder %s23_s20, %s23_s20 }
  0x1c   :  { %p405_p11 = scmp.ne.s32.totalorder %s23_s20, %s404_s29  ;;  %p410_p13 = scmp.lt.s32.totalorder %s404_s29, %s404_s29 }
  0x1e   :  { %p411_p0 = por %p410_p13, %p409_p12 }
  0x20   :  { %p412_p1 = pnand %p411_p0, %p405_p11 }
  0x22   :  { %415 = shalt.err (!%p412_p1)
}
  0x23   :  { %s494_s1 = smov 64   ;;  %s495_s28 = smov 4  }
  0x24   :  { %28 = dma.hbm_to_vmem [thread:$0]  %s643_s0, 128, %s23_s20, [#allocation3], %s494_s1, %s494_s1, %s495_s28  }
  0x25   :  { %s496_s10 = smov [#allocation7]   ;;  %s497_s12 = smov [#allocation8]  }
  0x26   :  { %s46_s11 = sshll.u32 %s496_s10, 4  ;;  %s60_s13 = sshll.u32 %s497_s12, 4  ;;  %s47_s11 = int_to_ptr.vmem [resolvable:$true] %s46_s11  ;;  %s573_s13 = int_to_ptr.vmem [resolvable:$true] %s60_s13 }
  0x27   :  { %s416_s16 = scalar_lea.hbm %s645_s2, 256 }
  0x28   :  { %p417_p2 = scmp.ne.s32.totalorder %s645_s2, %s416_s16  ;;  %p420_p3 = scmp.lt.u32.totalorder %s416_s16, %s645_s2 }
  0x2a   :  { %p422_p4 = pnand %p420_p3, %p417_p2 }
  0x2c   :  { %425 = shalt.err (!%p422_p4)
}
  0x2d   :  { %s426_s0 = scalar_lea.vmem %s47_s11, 256  ;;  %p431_p6 = scmp.lt.s32.totalorder %s47_s11, %s47_s11 }
  0x2e   :  { %p427_p5 = scmp.ne.s32.totalorder %s47_s11, %s426_s0  ;;  %p432_p7 = scmp.lt.s32.totalorder %s426_s0, %s426_s0 }
  0x30   :  { %p433_p8 = por %p432_p7, %p431_p6 }
  0x32   :  { %p434_p9 = pnand %p433_p8, %p427_p5 }
  0x34   :  { %437 = shalt.err (!%p434_p9)
}
  0x35   :  { %52 = dma.hbm_to_vmem [thread:$0]  %s645_s2, 256, %s47_s11, [#allocation6], %s494_s1, %s494_s1, %s495_s28  }
  0x36   :  { %s438_s25 = scalar_lea.hbm %s647_s4, 256 }
  0x37   :  { %p439_p10 = scmp.ne.s32.totalorder %s647_s4, %s438_s25  ;;  %p442_p11 = scmp.lt.u32.totalorder %s438_s25, %s647_s4 }
  0x39   :  { %p444_p12 = pnand %p442_p11, %p439_p10 }
  0x3b   :  { %447 = shalt.err (!%p444_p12)
}
  0x3c   :  { %s448_s9 = scalar_lea.vmem %s573_s13, 256  ;;  %p453_p0 = scmp.lt.s32.totalorder %s573_s13, %s573_s13 }
  0x3d   :  { %p449_p13 = scmp.ne.s32.totalorder %s573_s13, %s448_s9  ;;  %p454_p1 = scmp.lt.s32.totalorder %s448_s9, %s448_s9 }
  0x3f   :  { %p455_p2 = por %p454_p1, %p453_p0 }
  0x41   :  { %p456_p3 = pnand %p455_p2, %p449_p13 }
  0x43   :  { %459 = shalt.err (!%p456_p3)
}
  0x44   :  { %66 = dma.hbm_to_vmem [thread:$0]  %s647_s4, 256, %s573_s13, [#allocation9], %s494_s1, %s494_s1, %s495_s28  }
  0x45   :  { %482 = dma.done.wait [#allocation3], 128  }
  0x46   :  { %483 = vsyncadd [#allocation3], 4294967168 }
  0x47   :  { %484 = dma.done.wait [#allocation6], 512  }
  0x48   :  { %485 = vsyncadd [#allocation6], 4294966784 }
  0x49   :  { %486 = dma.done.wait [#allocation9], 256  }
  0x4a   :  { %487 = vsyncadd [#allocation9], 4294967040  ;;  %v498_v0 = vmov 0.0   ;;  %vm499_vm0 = vmmov 0   ;;  %v363_v1 = vld [vmem:[#allocation7] sm:$0xff]   ;;  %v364_v2 = vld [vmem:[#allocation7 + $0x8] sm:$0xff]  }
  0x4b   :  { %336 = vmatprep.subr.bf16.mxu0 %v498_v0  ;;  %340 = vmatprep.mubr.msk.bf16.mxu0 %vm499_vm0, %v498_v0  ;;  %v365_v3 = vld [vmem:[#allocation2] sm:$0xff]   ;;  %vm116_vm1 = vcmask 261120   ;;  %v366_v4 = vld [vmem:[#allocation8] sm:$0xff]   ;;  %v367_v5 = vld [vmem:[#allocation8 + $0x8] sm:$0xff]   ;;  %vm293_vm2 = vcmask 257024   ;;  %s500_s16 = smov [#allocation10]  }
  0x4c   :  { %344 = vmatprep.subr.bf16.mxu1 %v498_v0  ;;  %348 = vmatprep.mubr.msk.bf16.mxu1 %vm499_vm0, %v498_v0  ;;  %v315_v6 = vld [vmem:[%s646_s3] ss:$0 sm:$0xff]  ;;  %v168_v17 = vld [vmem:[#allocation5] sm:$0xff]  ;;  %v169_v21 = vld [vmem:[#allocation5 + $0x8] sm:$0xff]  ;;  %s301_s17 = sshll.u32 %s500_s16, 4  ;;  %s302_s17 = int_to_ptr.vmem [resolvable:$true] %s301_s17 }
  0x4d   :  { %337 = vmatpush3.bf16.msra.mxu0 %v363_v1  ;;  %345 = vmatpush3.bf16.msra.mxu1 %v366_v4  ;;  %v320_v16 = vld [vmem:[%s648_s5] ss:$0 sm:$0xff]  ;;  %p465_p5 = scmp.lt.s32.totalorder %s302_s17, %s302_s17 }
  0x4e   :  { %338 = vmatprep.subr.bf16.mxu0 %v498_v0  ;;  %346 = vmatprep.subr.bf16.mxu1 %v498_v0  ;;  %v324_v49 = vld [vmem:[%s649_s6] ss:$0 sm:$0xff]  ;;  %s460_s6 = scalar_lea.vmem %s302_s17, 128 }
  0x4f   :  { %v325_v53 = vld [vmem:[%s650_s7] ss:$0 sm:$0xff]  ;;  %p461_p4 = scmp.ne.s32.totalorder %s302_s17, %s460_s6  ;;  %p466_p6 = scmp.lt.s32.totalorder %s460_s6, %s460_s6 }
  0x51   :  { %339 = vmatpush3.bf16.msra.mxu0 %v364_v2  ;;  %347 = vmatpush3.bf16.msra.mxu1 %v367_v5  ;;  %p467_p7 = por %p466_p6, %p465_p5 }
  0x53   :  { %p468_p8 = pnand %p467_p7, %p461_p4 }
  0x54   :  { %341 = vmatmul.mubr.msk.bf16.vlgmr.msra.gmra.mrb[0].mxu0 %vm116_vm1, %v365_v3 }
 0x127   :  { %v154_v7 = vpop.f32.mrb[0].mxu0 }
 0x128   :  { %v155_v8 = vadd.f32 %v315_v6, %v154_v7  ;;  %v342_v9 = vpop.f32.mrb[1].mxu0 }
 0x129   :  { %v157_v10 = vpop.f32.mrb[2].mxu0 }
 0x12a   :  { %v158_v11 = vadd.f32 %v315_v6, %v157_v10  ;;  %v343_v12 = vpop.f32.mrb[3].mxu0  ;;  %v161_v13 = vmax.f32 %v155_v8, 0.0 }
 0x12c   :  { %v162_v14 = vmax.f32 %v158_v11, 0.0 }
 0x12e   :  { %v163_v15 = vpack.c.bf16 %v162_v14, %v161_v13 }
 0x130   :  { %349 = vmatmul.mubr.msk.bf16.vlgmr.msra.gmra.mrb[0].mxu1 %vm116_vm1, %v163_v15 }
 0x203   :  { %v226_v18 = vpop.f32.mrb[0].mxu1 }
 0x204   :  { %v227_v19 = vadd.f32 %v320_v16, %v226_v18  ;;  %v350_v20 = vpop.f32.mrb[1].mxu1 }
 0x205   :  { %v229_v22 = vpop.f32.mrb[2].mxu1 }
 0x206   :  { %v233_v23 = vadd.f32 %v227_v19, %v168_v17  ;;  %v230_v24 = vadd.f32 %v320_v16, %v229_v22  ;;  %v351_v25 = vpop.f32.mrb[3].mxu1 }
 0x208   :  { %v234_v26 = vadd.f32 %v230_v24, %v169_v21  ;;  %v235_v27 = vsel %vm116_vm1, %v233_v23, 0.0  ;;  %v241_v28 = vmul.f32 %v233_v23, %v233_v23 }
 0x209   :  { %236 = vadd.xlane.f32.xlu0 %v235_v27 }
 0x20a   :  { %v243_v29 = vsel %vm116_vm1, %v241_v28, 0.0  ;;  %v242_v30 = vmul.f32 %v234_v26, %v234_v26  ;;  %v238_v31 = vsel %vm116_vm1, %v234_v26, 0.0 }
 0x20b   :  { %244 = vadd.xlane.f32.xlu1 %v243_v29 }
 0x20c   :  { %v246_v32 = vsel %vm116_vm1, %v242_v30, 0.0 }
 0x20d   :  { %239 = vadd.xlane.f32.xlu0 %v238_v31 }
 0x20f   :  { %247 = vadd.xlane.f32.xlu1 %v246_v32 }
 0x296   :  { %v237_v33 = vpop.xlane.xlu0 %236 }
 0x297   :  { %v249_v34 = vmul.f32 0.03125, %v237_v33 }
 0x298   :  { %v245_v35 = vpop.xlane.xlu1 %244 }
 0x299   :  { %v253_v36 = vmul.f32 %v249_v34, %v249_v34  ;;  %v251_v37 = vmul.f32 0.03125, %v245_v35  ;;  %v272_v51 = vsub.f32 %v233_v23, %v249_v34 }
 0x29a   :  { %v240_v38 = vpop.xlane.xlu0 %239 }
 0x29b   :  { %v255_v39 = vsub.f32 %v251_v37, %v253_v36  ;;  %v250_v40 = vmul.f32 0.03125, %v240_v38 }
 0x29c   :  { %v248_v41 = vpop.xlane.xlu1 %247 }
 0x29d   :  { %v257_v42 = vmax.f32 %v255_v39, 0.0  ;;  %v254_v43 = vmul.f32 %v250_v40, %v250_v40  ;;  %v252_v44 = vmul.f32 0.03125, %v248_v41  ;;  %v273_v56 = vsub.f32 %v234_v26, %v250_v40 }
 0x29f   :  { %v259_v45 = vadd.f32 1e-12, %v257_v42  ;;  %v256_v46 = vsub.f32 %v252_v44, %v254_v43 }
 0x2a1   :  { %368 = vrsqrt.f32 %v259_v45  ;;  %v258_v47 = vmax.f32 %v256_v46, 0.0 }
 0x2a3   :  { %v260_v48 = vadd.f32 1e-12, %v258_v47 }
 0x2a5   :  { %370 = vrsqrt.f32 %v260_v48 }
 0x2ab   :  { %v369_v50 = vpop.eup %368 }
 0x2ac   :  { %v270_v52 = vmul.f32 %v369_v50, %v324_v49 }
 0x2ae   :  { %v274_v54 = vmul.f32 %v272_v51, %v270_v52 }
 0x2af   :  { %v371_v55 = vpop.eup %370 }
 0x2b0   :  { %v271_v57 = vmul.f32 %v371_v55, %v324_v49  ;;  %v283_v58 = vadd.f32 %v325_v53, %v274_v54 }
 0x2b2   :  { %v275_v59 = vmul.f32 %v273_v56, %v271_v57  ;;  %v328_v60 = vpack.c.bf16 %v283_v58, %v283_v58 }
 0x2b4   :  { %v284_v61 = vadd.f32 %v325_v53, %v275_v59  ;;  %294 = vst.msk [vmem:[#allocation10] sm:$0xf] %vm293_vm2, %v328_v60 }
 0x2b6   :  { %v329_v62 = vpack.c.bf16 %v284_v61, %v284_v61 }
 0x2b8   :  { %295 = vst.msk [vmem:[#allocation10 + $0x4] sm:$0xf] %vm293_vm2, %v329_v62 }
 0x2b9   :  { %471 = shalt.err (!%p468_p8)
}
 0x2ba   :  { %s472_s19 = scalar_lea.hbm %s651_s8, 128 }
 0x2bb   :  { %p473_p9 = scmp.ne.s32.totalorder %s651_s8, %s472_s19  ;;  %p476_p10 = scmp.lt.u32.totalorder %s472_s19, %s651_s8 }
 0x2bd   :  { %p478_p11 = pnand %p476_p10, %p473_p9 }
 0x2bf   :  { %481 = shalt.err (!%p478_p11)
}
 0x2c0   :  { %307 = dma.vmem_to_hbm [thread:$0]  %s302_s17, 128, %s651_s8, [#allocation4], %s494_s1, %s494_s1, %s495_s28  }
 0x2c1   :  { %488 = dma.done.wait [#allocation4], 128  }
 0x2c2   :  { %489 = vsyncadd [#allocation4], 4294967168 }
 0x2c3   :  { %311 = vsyncpa [#allocation3], 1 }
 0x2c4   :  { %312 = vsyncpa [#allocation6], 1 }
 0x2c5   :  { %313 = vsyncpa [#allocation9], 1 }
 0x2c6   :  { %314 = vsyncpa [#allocation4], 1 }

</bundles_post_ra>
